<compile_context>
chip_gen: v7x
topology: tpu7x:2x2x1
jax: 0.10.0
libtpu: 0.0.40
codegen_flags: <defaults>
</compile_context>

<pallas_src>
import functools

import jax
import jax.numpy as jnp
from jax import lax
from jax.experimental import pallas as pl
from jax.experimental.pallas import tpu as pltpu

_LANES = 128


def _round_up(x, m):
    return (x + m - 1) // m * m


def _fold_bn(conv_bias, gamma, beta, mean, var, eps):
    scale = gamma / jnp.sqrt(var + eps)
    shift = (conv_bias - mean) * scale + beta
    return scale, shift


def _band_weights(w_hwio, width, padding, kp, np_):
    """Fold the KW taps, channel mixing and width-direction zero padding of a
    'same' stride-1 conv into KH banded (W*Cin, W*Cout) matrices so the conv
    becomes KH row-shifted matmuls on lane-dense (H, W*C) activations."""
    KH, KW, Ci, Co = w_hwio.shape
    wi = jnp.arange(width)                         # input pixel (real coords)
    wo = jnp.arange(width)                         # output pixel
    kw = wi[:, None] - wo[None, :] + padding       # tap index, (W, W)
    valid = (kw >= 0) & (kw < KW)
    g = w_hwio[:, jnp.clip(kw, 0, KW - 1)]         # (KH, W, W, Ci, Co)
    g = jnp.where(valid[None, :, :, None, None], g, 0.0)
    m = jnp.transpose(g, (0, 1, 3, 2, 4)).reshape(KH, width * Ci, width * Co)
    m = jnp.pad(m, ((0, 0), (0, kp - width * Ci), (0, np_ - width * Co)))
    return m.astype(jnp.bfloat16)                  # rounded once, as in reference


def _resblock_kernel(x_ref, w1_ref, w2_ref, s1_ref, t1_ref, s2_ref, t2_ref,
                     o_ref, *, H, KH, pad, WC, Kp, Np):
    """Fused (conv1+BN1+ReLU) -> (conv2+BN2) -> +residual -> ReLU, one batch item.

    x_ref : (1, H, W*C)  f32 lane-dense input slab (also the residual)
    w*_ref: (KH, Kp, Np) bf16 banded conv weights (see _band_weights)
    s*/t* : (1, Np)      f32 folded BN scale / shift (conv bias folded in)
    o_ref : (1, H, W*C)  f32 lane-dense output slab
    """

    def widen(a):                                  # zero-pad lanes up to Kp
        if Kp == WC:                               # (no-op at the tested shape)
            return a
        return jnp.concatenate([a, jnp.zeros((H, Kp - WC), a.dtype)], axis=1)

    def shifted(a, kh):
        # Row h of the result is padded-input row (h + kh), i.e. real row
        # (h + kh - pad); out-of-range rows are the conv's zero padding.  Built
        # with a zero-row concat on a value already resident in vregs — no VMEM
        # scratch, no per-step memset, no misaligned window stores.
        off = kh - pad
        if off == 0:
            return a
        z = jnp.zeros((abs(off), a.shape[1]), a.dtype)
        if off < 0:
            return jnp.concatenate([z, a[:H + off, :]], axis=0)
        return jnp.concatenate([a[off:, :], z], axis=0)

    def conv(a_bf16, w_ref):
        # KH banded MXU matmuls; the (H, Np) f32 accumulator is ~2 vregs so the
        # accumulation never leaves the register file.
        acc = jnp.zeros((H, Np), jnp.float32)
        for kh in range(KH):                       # unrolled, KH is tiny/static
            acc = acc + jnp.dot(shifted(a_bf16, kh), w_ref[kh],
                                preferred_element_type=jnp.float32)
        return acc

    # conv1 + folded BN1 + ReLU.  Input rounded to bf16 exactly once; f32 epilogue.
    xb = widen(x_ref[0].astype(jnp.bfloat16))
    y1 = jnp.maximum(conv(xb, w1_ref) * s1_ref[...] + t1_ref[...], 0.0)

    # conv2 + folded BN2 + residual + ReLU.  conv1 output rounded to bf16 once.
    y1b = widen(y1[:, :WC].astype(jnp.bfloat16))
    y2 = conv(y1b, w2_ref) * s2_ref[...] + t2_ref[...]
    # Residual re-read from the resident input block (not held live across convs).
    o_ref[0] = jnp.maximum(y2[:, :WC] + x_ref[0], 0.0).astype(o_ref.dtype)


def _vmem_limit_bytes():
    # Generation-aware scoped-VMEM limit (v5e/v6e: 128 MiB physical, v7x: 64 MiB).
    try:
        cap = int(pltpu.get_tpu_info().vmem_capacity_bytes)
    except Exception:                              # conservative fallback
        cap = 64 * 1024 * 1024
    return int(min(cap * 3 // 4, 96 * 1024 * 1024))


def residual_block(x_nchw, params, *, padding=1, eps=1e-5):
    """Pallas equivalent of ResidualBlock.forward (stride=1, downsample=None)."""
    B, C, H, W = x_nchw.shape
    KH, KW, Ci, Co = params["w1"].shape
    assert Ci == C and Co == C, "stride=1 / no-downsample path only"
    assert params["w2"].shape == (KH, KW, C, C)
    assert KH == KW and 2 * padding == KH - 1, "'same' odd-kernel conv required"
    WC = W * C
    # TODO(synk): for large W*C, block the banded matmul over W (and add an H
    #             row-tile grid axis with a KH-1 halo) instead of whole rows.
    assert WC <= 1024, "whole-row banded-matmul path is meant for small W*C"

    Kp = _round_up(WC, _LANES)
    Np = _round_up(WC, _LANES)

    # NCHW -> lane-dense (B, H, W*C) f32 slab (free reshape of NHWC); no channel
    # padding of the HBM-side arrays.
    x = jnp.transpose(x_nchw, (0, 2, 3, 1)).astype(jnp.float32).reshape(B, H, WC)

    w1 = _band_weights(params["w1"].astype(jnp.float32), W, padding, Kp, Np)
    w2 = _band_weights(params["w2"].astype(jnp.float32), W, padding, Kp, Np)

    def fold(bias, gamma, beta, mean, var):
        s, t = _fold_bn(bias, gamma, beta, mean, var, eps)
        s = jnp.pad(jnp.tile(s, W), (0, Np - WC)).reshape(1, Np)
        t = jnp.pad(jnp.tile(t, W), (0, Np - WC)).reshape(1, Np)
        return s, t

    s1, t1 = fold(params["b1"], params["gamma1"], params["beta1"],
                  params["mean1"], params["var1"])
    s2, t2 = fold(params["b2"], params["gamma2"], params["beta2"],
                  params["mean2"], params["var2"])

    kernel = functools.partial(_resblock_kernel, H=H, KH=KH, pad=padding,
                               WC=WC, Kp=Kp, Np=Np)

    out = pl.pallas_call(
        kernel,
        out_shape=jax.ShapeDtypeStruct((B, H, WC), jnp.float32),
        grid=(B,),
        in_specs=[
            pl.BlockSpec((1, H, WC), lambda b: (b, 0, 0)),     # x / residual
            pl.BlockSpec((KH, Kp, Np), lambda b: (0, 0, 0)),   # banded w1 (resident)
            pl.BlockSpec((KH, Kp, Np), lambda b: (0, 0, 0)),   # banded w2 (resident)
            pl.BlockSpec((1, Np), lambda b: (0, 0)),           # scale1
            pl.BlockSpec((1, Np), lambda b: (0, 0)),           # shift1
            pl.BlockSpec((1, Np), lambda b: (0, 0)),           # scale2
            pl.BlockSpec((1, Np), lambda b: (0, 0)),           # shift2
        ],
        out_specs=pl.BlockSpec((1, H, WC), lambda b: (b, 0, 0)),
        compiler_params=pltpu.CompilerParams(
            dimension_semantics=("parallel",),   # megacore / v7x: split the batch
            vmem_limit_bytes=_vmem_limit_bytes()),
    )(x, w1, w2, s1, t1, s2, t2)

    # (B, H, W*C) -> NCHW.
    return jnp.transpose(out.reshape(B, H, W, C), (0, 3, 1, 2))


# ----------------------------- reference (pure JAX) -----------------------------
def _ref_block(x_nchw, params, *, padding=1, eps=1e-5):
    x = jnp.transpose(x_nchw, (0, 2, 3, 1)).astype(jnp.float32)
    r = lambda a: a.astype(jnp.bfloat16).astype(jnp.float32)  # mimic bf16 MXU inputs

    def conv(a, w):
        return lax.conv_general_dilated(
            r(a), r(w), window_strides=(1, 1),
            padding=[(padding, padding), (padding, padding)],
            dimension_numbers=("NHWC", "HWIO", "NHWC"),
            preferred_element_type=jnp.float32)

    s1, t1 = _fold_bn(params["b1"], params["gamma1"], params["beta1"],
                      params["mean1"], params["var1"], eps)
    s2, t2 = _fold_bn(params["b2"], params["gamma2"], params["beta2"],
                      params["mean2"], params["var2"], eps)
    o1 = jnp.maximum(conv(x, params["w1"]) * s1 + t1, 0.0)
    o2 = jnp.maximum(conv(o1, params["w2"]) * s2 + t2 + x, 0.0)
    return jnp.transpose(o2, (0, 3, 1, 2))


# ------------------------------------ main ---------------------------------------
if __name__ == "__main__":
    B, C, H, W = 2, 8, 16, 16           # in_channels == out_channels (no downsample)
    K, padding = 3, 1

    key = jax.random.PRNGKey(0)
    keys = jax.random.split(key, 13)

    params = {
        "w1": 0.1 * jax.random.normal(keys[0], (K, K, C, C), jnp.float32),
        "b1": 0.1 * jax.random.normal(keys[1], (C,), jnp.float32),
        "gamma1": 1.0 + 0.1 * jax.random.normal(keys[2], (C,), jnp.float32),
        "beta1": 0.1 * jax.random.normal(keys[3], (C,), jnp.float32),
        "mean1": 0.1 * jax.random.normal(keys[4], (C,), jnp.float32),
        "var1": 1.0 + 0.1 * jax.random.uniform(keys[5], (C,), jnp.float32),
        "w2": 0.1 * jax.random.normal(keys[6], (K, K, C, C), jnp.float32),
        "b2": 0.1 * jax.random.normal(keys[7], (C,), jnp.float32),
        "gamma2": 1.0 + 0.1 * jax.random.normal(keys[8], (C,), jnp.float32),
        "beta2": 0.1 * jax.random.normal(keys[9], (C,), jnp.float32),
        "mean2": 0.1 * jax.random.normal(keys[10], (C,), jnp.float32),
        "var2": 1.0 + 0.1 * jax.random.uniform(keys[11], (C,), jnp.float32),
    }
    x = jax.random.normal(keys[12], (B, C, H, W), jnp.float32)   # NCHW

    fwd = jax.jit(functools.partial(residual_block, padding=padding))
    out = jax.block_until_ready(fwd(x, params))
    ref = jax.block_until_ready(_ref_block(x, params, padding=padding))

    assert out.shape == (B, C, H, W)
    err = float(jnp.max(jnp.abs(out - ref)))
    # bf16 matmul operands (f32 accumulation): tolerance accounts for occasional
    # bf16 rounding-boundary flips of the conv1->conv2 intermediate.
    assert jnp.allclose(out, ref, atol=2e-2, rtol=2e-2), err
    print("KERNEL_OK")
</pallas_src>

<mosaic_0001>
module attributes {stable_mosaic.version = 11 : i64} {
  func.func @_resblock_kernel(%arg0: i32, %arg1: memref<1x16x128xf32, #tpu.memory_space<vmem>>, %arg2: memref<3x128x128xbf16, #tpu.memory_space<vmem>>, %arg3: memref<3x128x128xbf16, #tpu.memory_space<vmem>>, %arg4: memref<1x128xf32, #tpu.memory_space<vmem>>, %arg5: memref<1x128xf32, #tpu.memory_space<vmem>>, %arg6: memref<1x128xf32, #tpu.memory_space<vmem>>, %arg7: memref<1x128xf32, #tpu.memory_space<vmem>>, %arg8: memref<1x16x128xf32, #tpu.memory_space<vmem>>) attributes {dimension_semantics = [#tpu.dimension_semantics<parallel>], iteration_bounds = array<i64: 2>, scalar_prefetch = 0 : i64, scratch_operands = 0 : i64, tpu.core_type = #tpu.core_type<tc>, window_params = [{transform_indices = @transform_0, window_bounds = array<i64: 1, 16, 128>}, {pipeline_mode = #tpu.pipeline_mode<synchronous>, transform_indices = @transform_1, window_bounds = array<i64: 3, 128, 128>}, {pipeline_mode = #tpu.pipeline_mode<synchronous>, transform_indices = @transform_2, window_bounds = array<i64: 3, 128, 128>}, {pipeline_mode = #tpu.pipeline_mode<synchronous>, transform_indices = @transform_3, window_bounds = array<i64: 1, 128>}, {pipeline_mode = #tpu.pipeline_mode<synchronous>, transform_indices = @transform_4, window_bounds = array<i64: 1, 128>}, {pipeline_mode = #tpu.pipeline_mode<synchronous>, transform_indices = @transform_5, window_bounds = array<i64: 1, 128>}, {pipeline_mode = #tpu.pipeline_mode<synchronous>, transform_indices = @transform_6, window_bounds = array<i64: 1, 128>}, {transform_indices = @transform_7, window_bounds = array<i64: 1, 16, 128>}]} {
    %c0 = arith.constant 0 : index
    %c0_0 = arith.constant 0 : index
    %c0_1 = arith.constant 0 : index
    %0 = vector.load %arg1[%c0, %c0_0, %c0_1] : memref<1x16x128xf32, #tpu.memory_space<vmem>>, vector<1x16x128xf32>
    %1 = vector.shape_cast %0 : vector<1x16x128xf32> to vector<16x128xf32>
    %2 = arith.truncf %1 : vector<16x128xf32> to vector<16x128xbf16>
    %cst = arith.constant 0.000000e+00 : f32
    %3 = vector.broadcast %cst : f32 to vector<16x128xf32>
    %cst_2 = arith.constant 0.000000e+00 : bf16
    %4 = vector.broadcast %cst_2 : bf16 to vector<1x128xbf16>
    %5 = vector.extract_strided_slice %2 {offsets = [0, 0], sizes = [15, 128], strides = [1, 1]} : vector<16x128xbf16> to vector<15x128xbf16>
    %6 = tpu.concatenate %4, %5 in 0 : vector<1x128xbf16>, vector<15x128xbf16> -> vector<16x128xbf16>
    %c0_3 = arith.constant 0 : index
    %c0_4 = arith.constant 0 : index
    %c0_5 = arith.constant 0 : index
    %7 = vector.load %arg2[%c0_3, %c0_4, %c0_5] : memref<3x128x128xbf16, #tpu.memory_space<vmem>>, vector<1x128x128xbf16>
    %8 = vector.shape_cast %7 : vector<1x128x128xbf16> to vector<128x128xbf16>
    %cst_6 = arith.constant dense<0.000000e+00> : vector<16x128xf32>
    %9 = tpu.matmul %6, %8, %cst_6 {dimension_numbers = #tpu.dot_dimension_numbers<[1], [0], [0], [1], [0, 0, 1, 1], [], []>} : vector<16x128xbf16>, vector<128x128xbf16>, vector<16x128xf32> -> vector<16x128xf32>
    %10 = arith.addf %3, %9 : vector<16x128xf32>
    %c1 = arith.constant 1 : index
    %c0_7 = arith.constant 0 : index
    %c0_8 = arith.constant 0 : index
    %11 = vector.load %arg2[%c1, %c0_7, %c0_8] : memref<3x128x128xbf16, #tpu.memory_space<vmem>>, vector<1x128x128xbf16>
    %12 = vector.shape_cast %11 : vector<1x128x128xbf16> to vector<128x128xbf16>
    %cst_9 = arith.constant dense<0.000000e+00> : vector<16x128xf32>
    %13 = tpu.matmul %2, %12, %cst_9 {dimension_numbers = #tpu.dot_dimension_numbers<[1], [0], [0], [1], [0, 0, 1, 1], [], []>} : vector<16x128xbf16>, vector<128x128xbf16>, vector<16x128xf32> -> vector<16x128xf32>
    %14 = arith.addf %10, %13 : vector<16x128xf32>
    %cst_10 = arith.constant 0.000000e+00 : bf16
    %15 = vector.broadcast %cst_10 : bf16 to vector<1x128xbf16>
    %16 = vector.extract_strided_slice %2 {offsets = [1, 0], sizes = [15, 128], strides = [1, 1]} : vector<16x128xbf16> to vector<15x128xbf16>
    %17 = tpu.concatenate %16, %15 in 0 : vector<15x128xbf16>, vector<1x128xbf16> -> vector<16x128xbf16>
    %c2 = arith.constant 2 : index
    %c0_11 = arith.constant 0 : index
    %c0_12 = arith.constant 0 : index
    %18 = vector.load %arg2[%c2, %c0_11, %c0_12] : memref<3x128x128xbf16, #tpu.memory_space<vmem>>, vector<1x128x128xbf16>
    %19 = vector.shape_cast %18 : vector<1x128x128xbf16> to vector<128x128xbf16>
    %cst_13 = arith.constant dense<0.000000e+00> : vector<16x128xf32>
    %20 = tpu.matmul %17, %19, %cst_13 {dimension_numbers = #tpu.dot_dimension_numbers<[1], [0], [0], [1], [0, 0, 1, 1], [], []>} : vector<16x128xbf16>, vector<128x128xbf16>, vector<16x128xf32> -> vector<16x128xf32>
    %21 = arith.addf %14, %20 : vector<16x128xf32>
    %c0_14 = arith.constant 0 : index
    %c0_15 = arith.constant 0 : index
    %22 = vector.load %arg4[%c0_14, %c0_15] : memref<1x128xf32, #tpu.memory_space<vmem>>, vector<1x128xf32>
    %23 = vector.broadcast %22 : vector<1x128xf32> to vector<16x128xf32>
    %24 = arith.mulf %21, %23 : vector<16x128xf32>
    %c0_16 = arith.constant 0 : index
    %c0_17 = arith.constant 0 : index
    %25 = vector.load %arg5[%c0_16, %c0_17] : memref<1x128xf32, #tpu.memory_space<vmem>>, vector<1x128xf32>
    %26 = vector.broadcast %25 : vector<1x128xf32> to vector<16x128xf32>
    %27 = arith.addf %24, %26 : vector<16x128xf32>
    %cst_18 = arith.constant 0.000000e+00 : f32
    %28 = vector.broadcast %cst_18 : f32 to vector<16x128xf32>
    %29 = arith.maximumf %27, %28 : vector<16x128xf32>
    %30 = arith.truncf %29 : vector<16x128xf32> to vector<16x128xbf16>
    %cst_19 = arith.constant 0.000000e+00 : f32
    %31 = vector.broadcast %cst_19 : f32 to vector<16x128xf32>
    %cst_20 = arith.constant 0.000000e+00 : bf16
    %32 = vector.broadcast %cst_20 : bf16 to vector<1x128xbf16>
    %33 = vector.extract_strided_slice %30 {offsets = [0, 0], sizes = [15, 128], strides = [1, 1]} : vector<16x128xbf16> to vector<15x128xbf16>
    %34 = tpu.concatenate %32, %33 in 0 : vector<1x128xbf16>, vector<15x128xbf16> -> vector<16x128xbf16>
    %c0_21 = arith.constant 0 : index
    %c0_22 = arith.constant 0 : index
    %c0_23 = arith.constant 0 : index
    %35 = vector.load %arg3[%c0_21, %c0_22, %c0_23] : memref<3x128x128xbf16, #tpu.memory_space<vmem>>, vector<1x128x128xbf16>
    %36 = vector.shape_cast %35 : vector<1x128x128xbf16> to vector<128x128xbf16>
    %cst_24 = arith.constant dense<0.000000e+00> : vector<16x128xf32>
    %37 = tpu.matmul %34, %36, %cst_24 {dimension_numbers = #tpu.dot_dimension_numbers<[1], [0], [0], [1], [0, 0, 1, 1], [], []>} : vector<16x128xbf16>, vector<128x128xbf16>, vector<16x128xf32> -> vector<16x128xf32>
    %38 = arith.addf %31, %37 : vector<16x128xf32>
    %c1_25 = arith.constant 1 : index
    %c0_26 = arith.constant 0 : index
    %c0_27 = arith.constant 0 : index
    %39 = vector.load %arg3[%c1_25, %c0_26, %c0_27] : memref<3x128x128xbf16, #tpu.memory_space<vmem>>, vector<1x128x128xbf16>
    %40 = vector.shape_cast %39 : vector<1x128x128xbf16> to vector<128x128xbf16>
    %cst_28 = arith.constant dense<0.000000e+00> : vector<16x128xf32>
    %41 = tpu.matmul %30, %40, %cst_28 {dimension_numbers = #tpu.dot_dimension_numbers<[1], [0], [0], [1], [0, 0, 1, 1], [], []>} : vector<16x128xbf16>, vector<128x128xbf16>, vector<16x128xf32> -> vector<16x128xf32>
    %42 = arith.addf %38, %41 : vector<16x128xf32>
    %cst_29 = arith.constant 0.000000e+00 : bf16
    %43 = vector.broadcast %cst_29 : bf16 to vector<1x128xbf16>
    %44 = vector.extract_strided_slice %30 {offsets = [1, 0], sizes = [15, 128], strides = [1, 1]} : vector<16x128xbf16> to vector<15x128xbf16>
    %45 = tpu.concatenate %44, %43 in 0 : vector<15x128xbf16>, vector<1x128xbf16> -> vector<16x128xbf16>
    %c2_30 = arith.constant 2 : index
    %c0_31 = arith.constant 0 : index
    %c0_32 = arith.constant 0 : index
    %46 = vector.load %arg3[%c2_30, %c0_31, %c0_32] : memref<3x128x128xbf16, #tpu.memory_space<vmem>>, vector<1x128x128xbf16>
    %47 = vector.shape_cast %46 : vector<1x128x128xbf16> to vector<128x128xbf16>
    %cst_33 = arith.constant dense<0.000000e+00> : vector<16x128xf32>
    %48 = tpu.matmul %45, %47, %cst_33 {dimension_numbers = #tpu.dot_dimension_numbers<[1], [0], [0], [1], [0, 0, 1, 1], [], []>} : vector<16x128xbf16>, vector<128x128xbf16>, vector<16x128xf32> -> vector<16x128xf32>
    %49 = arith.addf %42, %48 : vector<16x128xf32>
    %c0_34 = arith.constant 0 : index
    %c0_35 = arith.constant 0 : index
    %50 = vector.load %arg6[%c0_34, %c0_35] : memref<1x128xf32, #tpu.memory_space<vmem>>, vector<1x128xf32>
    %51 = vector.broadcast %50 : vector<1x128xf32> to vector<16x128xf32>
    %52 = arith.mulf %49, %51 : vector<16x128xf32>
    %c0_36 = arith.constant 0 : index
    %c0_37 = arith.constant 0 : index
    %53 = vector.load %arg7[%c0_36, %c0_37] : memref<1x128xf32, #tpu.memory_space<vmem>>, vector<1x128xf32>
    %54 = vector.broadcast %53 : vector<1x128xf32> to vector<16x128xf32>
    %55 = arith.addf %52, %54 : vector<16x128xf32>
    %c0_38 = arith.constant 0 : index
    %c0_39 = arith.constant 0 : index
    %c0_40 = arith.constant 0 : index
    %56 = vector.load %arg1[%c0_38, %c0_39, %c0_40] : memref<1x16x128xf32, #tpu.memory_space<vmem>>, vector<1x16x128xf32>
    %57 = vector.shape_cast %56 : vector<1x16x128xf32> to vector<16x128xf32>
    %58 = arith.addf %55, %57 : vector<16x128xf32>
    %cst_41 = arith.constant 0.000000e+00 : f32
    %59 = vector.broadcast %cst_41 : f32 to vector<16x128xf32>
    %60 = arith.maximumf %58, %59 : vector<16x128xf32>
    %c0_42 = arith.constant 0 : index
    %c0_43 = arith.constant 0 : index
    %c0_44 = arith.constant 0 : index
    %61 = vector.load %arg8[%c0_42, %c0_43, %c0_44] : memref<1x16x128xf32, #tpu.memory_space<vmem>>, vector<1x16x128xf32>
    %62 = vector.shape_cast %61 : vector<1x16x128xf32> to vector<16x128xf32>
    %63 = vector.shape_cast %60 : vector<16x128xf32> to vector<1x16x128xf32>
    tpu.vector_store %arg8[%c0_42, %c0_43, %c0_44], %63 {strides = array<i32>} : memref<1x16x128xf32, #tpu.memory_space<vmem>>, vector<1x16x128xf32>,
    return
  }
  func.func @transform_0(%arg0: i32) -> (i32, i32, i32) {
    %c0_i32 = arith.constant 0 : i32
    %c0_i32_0 = arith.constant 0 : i32
    %c0_i32_1 = arith.constant 0 : i32
    return %arg0, %c0_i32, %c0_i32_0 : i32, i32, i32
  }
  func.func @transform_1(%arg0: i32) -> (i32, i32, i32) {
    %c0_i32 = arith.constant 0 : i32
    %c0_i32_0 = arith.constant 0 : i32
    %c0_i32_1 = arith.constant 0 : i32
    %c0_i32_2 = arith.constant 0 : i32
    return %c0_i32, %c0_i32_0, %c0_i32_1 : i32, i32, i32
  }
  func.func @transform_2(%arg0: i32) -> (i32, i32, i32) {
    %c0_i32 = arith.constant 0 : i32
    %c0_i32_0 = arith.constant 0 : i32
    %c0_i32_1 = arith.constant 0 : i32
    %c0_i32_2 = arith.constant 0 : i32
    return %c0_i32, %c0_i32_0, %c0_i32_1 : i32, i32, i32
  }
  func.func @transform_3(%arg0: i32) -> (i32, i32) {
    %c0_i32 = arith.constant 0 : i32
    %c0_i32_0 = arith.constant 0 : i32
    %c0_i32_1 = arith.constant 0 : i32
    return %c0_i32, %c0_i32_0 : i32, i32
  }
  func.func @transform_4(%arg0: i32) -> (i32, i32) {
    %c0_i32 = arith.constant 0 : i32
    %c0_i32_0 = arith.constant 0 : i32
    %c0_i32_1 = arith.constant 0 : i32
    return %c0_i32, %c0_i32_0 : i32, i32
  }
  func.func @transform_5(%arg0: i32) -> (i32, i32) {
    %c0_i32 = arith.constant 0 : i32
    %c0_i32_0 = arith.constant 0 : i32
    %c0_i32_1 = arith.constant 0 : i32
    return %c0_i32, %c0_i32_0 : i32, i32
  }
  func.func @transform_6(%arg0: i32) -> (i32, i32) {
    %c0_i32 = arith.constant 0 : i32
    %c0_i32_0 = arith.constant 0 : i32
    %c0_i32_1 = arith.constant 0 : i32
    return %c0_i32, %c0_i32_0 : i32, i32
  }
  func.func @transform_7(%arg0: i32) -> (i32, i32, i32) {
    %c0_i32 = arith.constant 0 : i32
    %c0_i32_0 = arith.constant 0 : i32
    %c0_i32_1 = arith.constant 0 : i32
    return %arg0, %c0_i32, %c0_i32_0 : i32, i32, i32
  }
}

</mosaic_0001>

<bundles_post_ra>
// kernel: tile.23
= control target key start
LH: loop header
LB: loop body
LE: loop exit
PB: predicated region body
PF: predicated region fallthrough
CT: control target
= control target key end

     0   :  { %s28_s0 = inlined_call_operand.vmem [shape: f32[8], index: 0, kind: input, shape index: {}]   ;;  %s29_s1 = inlined_call_operand.vmem [shape: f32[16,8], index: 1, kind: output, shape index: {}]  }
   0x1   :  { %v4_v0 = vld [vmem:[%s28_s0] ss:$0 sm:$0xff] }
   0x2   :  { %5 = vst [vmem:[%s29_s1] sm:$0xff] %v4_v0  ;;  %8 = vst [vmem:[%s29_s1 + $0x8] sm:$0xff] %v4_v0 }

// kernel: residual_block.1
= control target key start
LH: loop header
LB: loop body
LE: loop exit
PB: predicated region body
PF: predicated region fallthrough
CT: control target
= control target key end

     0   :  { %s1480_s24 = smov 0   ;;  %s1749_s0 = inlined_call_operand.vmem [shape: f32[2,16,128], index: 0, kind: input, shape index: {}]   ;;  %s1750_s1 = inlined_call_operand.vmem [shape: bf16[3,128,128], index: 1, kind: input, shape index: {}]   ;;  %s1751_s2 = inlined_call_operand.vmem [shape: bf16[3,128,128], index: 2, kind: input, shape index: {}]   ;;  %s1752_s3 = inlined_call_operand.vmem [shape: f32[1,128], index: 3, kind: input, shape index: {}]   ;;  %s1753_s4 = inlined_call_operand.vmem [shape: f32[1,128], index: 4, kind: input, shape index: {}]   ;;  %s1754_s5 = inlined_call_operand.vmem [shape: f32[1,128], index: 5, kind: input, shape index: {}]   ;;  %s1755_s6 = inlined_call_operand.vmem [shape: f32[1,128], index: 6, kind: input, shape index: {}]   ;;  %s1756_s7 = inlined_call_operand.vmem [shape: f32[2,16,128], index: 7, kind: output, shape index: {}]  }
   0x1 LB: > { %s1053_s25 = sadd.s32 4294967295, %s1436_s24   ;;  %p1057_p0 = scmp.ge.s32.totalorder %s1436_s24, 1  ;;  %s1436_s24 = sphi %s1480_s24, %s17_s24  }
   0x2   : > { %p237_p1 = scmp.lt.s32.totalorder %s1436_s24, 3 }
   0x4   : > { %p238_p2 = pnand %p1057_p0, %p237_p1 }
   0x5   : > { %v1382_v0 = vld [vmem:[%s1750_s1 + $0x40] sm:$0xff] (!%p238_p2)   ;;  %v1438_v1 = vmov (!%p238_p2), 0.0   ;;  %v1383_v2 = vld [vmem:[%s1750_s1 + $0x48] sm:$0xff] (!%p238_p2)   ;;  %vm1439_vm0 = vmmov (!%p238_p2), 0   ;;  %v1384_v3 = vld [vmem:[%s1750_s1 + $0x50] sm:$0xff] (!%p238_p2)   ;;  %p269_p3 = scmp.lt.s32.totalorder (!%p238_p2), %s1053_s25, 1 }
   0x6   : > { %241 = sbr.rel (%p238_p2) target bundleno = 611 (0x263), region = 48  ;;  %1236 = vmatprep.subr.bf16.mxu0 (!%p238_p2), %v1438_v1  ;;  %1296 = vmatprep.subr.bf16.mxu1 (!%p238_p2), %v1438_v1  ;;  %v1385_v4 = vld [vmem:[%s1750_s1 + $0x58] sm:$0xff] (!%p238_p2)   ;;  %v1386_v5 = vld [vmem:[%s1750_s1 + $0x60] sm:$0xff] (!%p238_p2)   ;;  %v1387_v6 = vld [vmem:[%s1750_s1 + $0x68] sm:$0xff] (!%p238_p2)   ;;  %vm291_vm1 = vcmask (!%p238_p2), 1040384   ;;  %vm509_vm4 = vcmask (!%p238_p2), 1047552  }
   0x7   : > { %1237 = vmatpush3.bf16.msra.mxu0 (!%p238_p2), %v1382_v0  ;;  %1252 = vmatprep.mubr.msk.bf16.mxu0 (!%p238_p2), %vm1439_vm0, %v1438_v1  ;;  %v1388_v7 = vld [vmem:[%s1750_s1 + $0x70] sm:$0xff] (!%p238_p2)   ;;  %v1389_v8 = vld [vmem:[%s1750_s1 + $0x78] sm:$0xff] (!%p238_p2)   ;;  %v1406_v11 = vld [vmem:[%s1751_s2 + $0x40] sm:$0xff] (!%p238_p2)   ;;  %vm292_vm2 = vsmask.f32 (!%p238_p2), 256 }
   0x8   : > { %1238 = vmatprep.subr.bf16.mxu0 (!%p238_p2), %v1438_v1  ;;  %1312 = vmatprep.mubr.msk.bf16.mxu1 (!%p238_p2), %vm1439_vm0, %v1438_v1  ;;  %v1407_v12 = vld [vmem:[%s1751_s2 + $0x48] sm:$0xff] (!%p238_p2)   ;;  %v1390_v14 = vld [vmem:[%s1750_s1] sm:$0xff] (!%p238_p2)   ;;  %v1408_v15 = vld [vmem:[%s1751_s2 + $0x50] sm:$0xff] (!%p238_p2)   ;;  %vm510_vm5 = vsmask.f32 (!%p238_p2), 7424 }
   0x9   : > { %1297 = vmatpush3.bf16.msra.mxu1 (!%p238_p2), %v1406_v11  ;;  %v1391_v16 = vld [vmem:[%s1750_s1 + $0x8] sm:$0xff] (!%p238_p2)   ;;  %v1409_v17 = vld [vmem:[%s1751_s2 + $0x58] sm:$0xff] (!%p238_p2)   ;;  %v1392_v18 = vld [vmem:[%s1750_s1 + $0x10] sm:$0xff] (!%p238_p2)  }
   0xa   : > { %1298 = vmatprep.subr.bf16.mxu1 (!%p238_p2), %v1438_v1  ;;  %v1410_v19 = vld [vmem:[%s1751_s2 + $0x60] sm:$0xff] (!%p238_p2)   ;;  %v1393_v20 = vld [vmem:[%s1750_s1 + $0x18] sm:$0xff] (!%p238_p2)   ;;  %v1411_v21 = vld [vmem:[%s1751_s2 + $0x68] sm:$0xff] (!%p238_p2)  }
   0xb   : > { %1239 = vmatpush3.bf16.msra.mxu0 (!%p238_p2), %v1383_v2  ;;  %v1394_v22 = vld [vmem:[%s1750_s1 + $0x20] sm:$0xff] (!%p238_p2)   ;;  %v1395_v24 = vld [vmem:[%s1750_s1 + $0x28] sm:$0xff] (!%p238_p2)   ;;  %v1396_v25 = vld [vmem:[%s1750_s1 + $0x30] sm:$0xff] (!%p238_p2)  }
   0xc   : > { %1240 = vmatprep.subr.bf16.mxu0 (!%p238_p2), %v1438_v1  ;;  %v1397_v28 = vld [vmem:[%s1750_s1 + $0x38] sm:$0xff] (!%p238_p2)   ;;  %vm1602_vm3 = vmand (!%p238_p2), %vm291_vm1, %vm292_vm2  ;;  %v1398_v32 = vld [vmem:[%s1750_s1 + $0x80] sm:$0xff] (!%p238_p2)  }
   0xd   : > { %s1762_s25 = smov (!%p269_p3, %s1053_s25), 1  ;;  %1299 = vmatpush3.bf16.msra.mxu1 %v1407_v12  ;;  %v1399_v33 = vld [vmem:[%s1750_s1 + $0x88] sm:$0xff]   ;;  %v1400_v34 = vld [vmem:[%s1750_s1 + $0x90] sm:$0xff]   ;;  %v1401_v35 = vld [vmem:[%s1750_s1 + $0x98] sm:$0xff]  }
   0xe   : > { %s1180_s15 = sshll.u32 %s1762_s25, 4  ;;  %1300 = vmatprep.subr.bf16.mxu1 %v1438_v1  ;;  %v1402_v36 = vld [vmem:[%s1750_s1 + $0xa0] sm:$0xff]   ;;  %v1403_v37 = vld [vmem:[%s1750_s1 + $0xa8] sm:$0xff]   ;;  %v1404_v38 = vld [vmem:[%s1750_s1 + $0xb0] sm:$0xff]  }
   0xf   : > { %1241 = vmatpush3.bf16.msra.mxu0 %v1384_v3  ;;  %s273_s18 = scalar_lea.vmem %s1749_s0, %s1180_s15  ;;  %v1405_v40 = vld [vmem:[%s1750_s1 + $0xb8] sm:$0xff]   ;;  %vm1642_vm6 = vmand %vm509_vm4, %vm510_vm5  ;;  %v1412_v44 = vld [vmem:[%s1751_s2 + $0x70] sm:$0xff]   ;;  %s278_s12 = scalar_lea.vmem %s1756_s7, %s1180_s15 }
  0x10   : > { %1242 = vmatprep.subr.bf16.mxu0 %v1438_v1  ;;  %v1532_v9 = vld [vmem:[%s273_s18] sm:$0xff]  ;;  %v1534_v10 = vld [vmem:[%s273_s18 + $0x8] sm:$0xff]  ;;  %v1413_v45 = vld [vmem:[%s1751_s2 + $0x78] sm:$0xff]  }
  0x11   : > { %v1545_v13 = vpack.c.bf16 %v1534_v10, %v1532_v9  ;;  %1301 = vmatpush3.bf16.msra.mxu1 %v1408_v15  ;;  %v1118_v46 = vld [vmem:[%s1752_s3] ss:$0 sm:$0xff]  ;;  %v1415_v60 = vld [vmem:[%s1751_s2 + $0x8] sm:$0xff]   ;;  %v1416_v61 = vld [vmem:[%s1751_s2 + $0x10] sm:$0xff]  }
  0x12   : > { %1302 = vmatprep.subr.bf16.mxu1 %v1438_v1  ;;  %v1119_v48 = vld [vmem:[%s1753_s4] ss:$0 sm:$0xff]  ;;  %v1417_v62 = vld [vmem:[%s1751_s2 + $0x18] sm:$0xff]   ;;  %v1419_v0 = vld [vmem:[%s1751_s2 + $0x28] sm:$0xff]  }
  0x13   : > { %1243 = vmatpush3.bf16.msra.mxu0 %v1385_v4  ;;  %v284_v23 = vshrl.u32 %v1545_v13, 16  ;;  %v287_v27 = vshll.u32 %v1545_v13, 16  ;;  %v1414_v58 = vld [vmem:[%s1751_s2] sm:$0xff]   ;;  %v1420_v3 = vld [vmem:[%s1751_s2 + $0x30] sm:$0xff]   ;;  %v1423_v12 = vld [vmem:[%s1751_s2 + $0x88] sm:$0xff]  }
  0x14   : > { %1244 = vmatprep.subr.bf16.mxu0 %v1438_v1  ;;  %v1418_v63 = vld [vmem:[%s1751_s2 + $0x20] sm:$0xff]  }
  0x15   : > { %1303 = vmatpush3.bf16.msra.mxu1 %v1409_v17  ;;  %v286_v26 = vrot.slane %v284_v23, 7  ;;  %v506_v39 = vrot.slane %v287_v27, 1  ;;  %v1426_v15 = vld [vmem:[%s1751_s2 + $0xa0] sm:$0xff]   ;;  %v1428_v17 = vld [vmem:[%s1751_s2 + $0xb0] sm:$0xff]  }
  0x16   : > { %1304 = vmatprep.subr.bf16.mxu1 %v1438_v1 }
  0x17   : > { %1245 = vmatpush3.bf16.msra.mxu0 %v1386_v5  ;;  %v289_v29 = vor.u32 %v287_v27, %v286_v26  ;;  %v507_v41 = vor.u32 %v506_v39, %v284_v23  ;;  %v1421_v5 = vld [vmem:[%s1751_s2 + $0x38] sm:$0xff]  }
  0x18   : > { %1246 = vmatprep.subr.bf16.mxu0 %v1438_v1 }
  0x19   : > { %1305 = vmatpush3.bf16.msra.mxu1 %v1410_v19  ;;  %v294_v31 = vsel %vm1602_vm3, 0, %v289_v29  ;;  %v512_v43 = vsel %vm1642_vm6, %v507_v41, 0  ;;  %v1429_v19 = vld [vmem:[%s1751_s2 + $0xb8] sm:$0xff]  }
  0x1a   : > { %1306 = vmatprep.subr.bf16.mxu1 %v1438_v1 }
  0x1b   : > { %1247 = vmatpush3.bf16.msra.mxu0 %v1387_v6 }
  0x1c   : > { %1248 = vmatprep.subr.bf16.mxu0 %v1438_v1 }
  0x1d   : > { %1307 = vmatpush3.bf16.msra.mxu1 %v1411_v21 }
  0x1e   : > { %1308 = vmatprep.subr.bf16.mxu1 %v1438_v1 }
  0x1f   : > { %1249 = vmatpush3.bf16.msra.mxu0 %v1388_v7 }
  0x20   : > { %1250 = vmatprep.subr.bf16.mxu0 %v1438_v1 }
  0x21   : > { %1309 = vmatpush3.bf16.msra.mxu1 %v1412_v44 }
  0x22   : > { %1310 = vmatprep.subr.bf16.mxu1 %v1438_v1 }
  0x23   : > { %1251 = vmatpush3.bf16.msra.mxu0 %v1389_v8  ;;  %v1422_v8 = vld [vmem:[%s1751_s2 + $0x80] sm:$0xff]  }
  0x24   : > { %1256 = vmatprep.subr.bf16.mxu0 %v1438_v1 }
  0x25   : > { %1311 = vmatpush3.bf16.msra.mxu1 %v1413_v45 }
  0x26   : > { %1253 = vmatmul.mubr.bf16.vlgmr.msra.gmra.mrb[0].mxu0 %v1545_v13  ;;  %1316 = vmatprep.subr.bf16.mxu1 %v1438_v1  ;;  %v1424_v13 = vld [vmem:[%s1751_s2 + $0x90] sm:$0xff]  }
  0x27   : > { %1257 = vmatpush3.bf16.msra.mxu0 %v1390_v14  ;;  %1272 = vmatprep.mubr.msk.bf16.mxu0 %vm1439_vm0, %v1438_v1  ;;  %v1425_v14 = vld [vmem:[%s1751_s2 + $0x98] sm:$0xff]  }
  0x28   : > { %1258 = vmatprep.subr.bf16.mxu0 %v1438_v1 }
  0x2b   : > { %1259 = vmatpush3.bf16.msra.mxu0 %v1391_v16  ;;  %v1427_v16 = vld [vmem:[%s1751_s2 + $0xa8] sm:$0xff]  }
  0x2c   : > { %1260 = vmatprep.subr.bf16.mxu0 %v1438_v1 }
  0x2f   : > { %1261 = vmatpush3.bf16.msra.mxu0 %v1392_v18 }
  0x30   : > { %1262 = vmatprep.subr.bf16.mxu0 %v1438_v1 }
  0x33   : > { %1263 = vmatpush3.bf16.msra.mxu0 %v1393_v20 }
  0x34   : > { %1264 = vmatprep.subr.bf16.mxu0 %v1438_v1 }
  0x37   : > { %1265 = vmatpush3.bf16.msra.mxu0 %v1394_v22  ;;  %v1176_v22 = vld [vmem:[%s1754_s5] ss:$0 sm:$0xff] }
  0x38   : > { %1266 = vmatprep.subr.bf16.mxu0 %v1438_v1 }
  0x3b   : > { %1267 = vmatpush3.bf16.msra.mxu0 %v1395_v24  ;;  %v1177_v24 = vld [vmem:[%s1755_s6] ss:$0 sm:$0xff] }
  0x3c   : > { %1268 = vmatprep.subr.bf16.mxu0 %v1438_v1 }
  0x3f   : > { %1269 = vmatpush3.bf16.msra.mxu0 %v1396_v25 }
  0x40   : > { %1270 = vmatprep.subr.bf16.mxu0 %v1438_v1 }
  0x43   : > { %1271 = vmatpush3.bf16.msra.mxu0 %v1397_v28 }
  0x44   : > { %1276 = vmatprep.subr.bf16.mxu0 %v1438_v1 }
  0x46   : > { %1273 = vmatmul.mubr.bf16.vlgmr.msra.gmra.mrb[0].mxu0 %v294_v31 }
  0x47   : > { %1277 = vmatpush3.bf16.msra.mxu0 %v1398_v32  ;;  %1292 = vmatprep.mubr.msk.bf16.mxu0 %vm1439_vm0, %v1438_v1 }
  0x48   : > { %1278 = vmatprep.subr.bf16.mxu0 %v1438_v1 }
  0x4b   : > { %1279 = vmatpush3.bf16.msra.mxu0 %v1399_v33 }
  0x4c   : > { %1280 = vmatprep.subr.bf16.mxu0 %v1438_v1 }
  0x4f   : > { %1281 = vmatpush3.bf16.msra.mxu0 %v1400_v34 }
  0x50   : > { %1282 = vmatprep.subr.bf16.mxu0 %v1438_v1 }
  0x53   : > { %1283 = vmatpush3.bf16.msra.mxu0 %v1401_v35 }
  0x54   : > { %1284 = vmatprep.subr.bf16.mxu0 %v1438_v1 }
  0x57   : > { %1285 = vmatpush3.bf16.msra.mxu0 %v1402_v36 }
  0x58   : > { %1286 = vmatprep.subr.bf16.mxu0 %v1438_v1 }
  0x5b   : > { %1287 = vmatpush3.bf16.msra.mxu0 %v1403_v37 }
  0x5c   : > { %1288 = vmatprep.subr.bf16.mxu0 %v1438_v1 }
  0x5f   : > { %1289 = vmatpush3.bf16.msra.mxu0 %v1404_v38 }
  0x60   : > { %1290 = vmatprep.subr.bf16.mxu0 %v1438_v1 }
  0x63   : > { %1291 = vmatpush3.bf16.msra.mxu0 %v1405_v40 }
  0x66   : > { %1293 = vmatmul.mubr.bf16.vlgmr.msra.gmra.mrb[0].mxu0 %v512_v43 }
 0x139   : > { %v612_v47 = vpop.f32.mrb[0].mxu0 }
 0x13a   : > { %v628_v49 = vmul.f32 %v1118_v46, %v612_v47  ;;  %v1294_v50 = vpop.f32.mrb[1].mxu0 }
 0x13b   : > { %v615_v51 = vpop.f32.mrb[2].mxu0 }
 0x13c   : > { %v637_v52 = vadd.f32 %v1119_v48, %v628_v49  ;;  %v629_v53 = vmul.f32 %v1118_v46, %v615_v51  ;;  %v1295_v54 = vpop.f32.mrb[3].mxu0 }
 0x13e   : > { %v638_v55 = vadd.f32 %v1119_v48, %v629_v53  ;;  %v639_v56 = vmax.f32 %v637_v52, 0.0 }
 0x140   : > { %v640_v57 = vmax.f32 %v638_v55, 0.0 }
 0x142   : > { %v641_v59 = vpack.c.bf16 %v640_v57, %v639_v56 }
 0x144   : > { %1313 = vmatmul.mubr.bf16.vlgmr.msra.gmra.mrb[0].mxu1 %v641_v59  ;;  %v643_v2 = vshrl.u32 %v641_v59, 16  ;;  %v646_v6 = vshll.u32 %v641_v59, 16 }
 0x145   : > { %1317 = vmatpush3.bf16.msra.mxu1 %v1414_v58  ;;  %1332 = vmatprep.mubr.msk.bf16.mxu1 %vm1439_vm0, %v1438_v1 }
 0x146   : > { %1318 = vmatprep.subr.bf16.mxu1 %v1438_v1  ;;  %v645_v4 = vrot.slane %v643_v2, 7  ;;  %v862_v18 = vrot.slane %v646_v6, 1 }
 0x148   : > { %v648_v7 = vor.u32 %v646_v6, %v645_v4  ;;  %v863_v20 = vor.u32 %v862_v18, %v643_v2 }
 0x149   : > { %1319 = vmatpush3.bf16.msra.mxu1 %v1415_v60 }
 0x14a   : > { %1320 = vmatprep.subr.bf16.mxu1 %v1438_v1  ;;  %v650_v11 = vsel %vm1602_vm3, 0, %v648_v7  ;;  %v865_v21 = vsel %vm1642_vm6, %v863_v20, 0 }
 0x14d   : > { %1321 = vmatpush3.bf16.msra.mxu1 %v1416_v61 }
 0x14e   : > { %1322 = vmatprep.subr.bf16.mxu1 %v1438_v1 }
 0x151   : > { %1323 = vmatpush3.bf16.msra.mxu1 %v1417_v62 }
 0x152   : > { %1324 = vmatprep.subr.bf16.mxu1 %v1438_v1 }
 0x155   : > { %1325 = vmatpush3.bf16.msra.mxu1 %v1418_v63 }
 0x156   : > { %1326 = vmatprep.subr.bf16.mxu1 %v1438_v1 }
 0x159   : > { %1327 = vmatpush3.bf16.msra.mxu1 %v1419_v0 }
 0x15a   : > { %1328 = vmatprep.subr.bf16.mxu1 %v1438_v1 }
 0x15d   : > { %1329 = vmatpush3.bf16.msra.mxu1 %v1420_v3 }
 0x15e   : > { %1330 = vmatprep.subr.bf16.mxu1 %v1438_v1 }
 0x161   : > { %1331 = vmatpush3.bf16.msra.mxu1 %v1421_v5 }
 0x162   : > { %1336 = vmatprep.subr.bf16.mxu1 %v1438_v1 }
 0x164   : > { %1333 = vmatmul.mubr.bf16.vlgmr.msra.gmra.mrb[0].mxu1 %v650_v11 }
 0x165   : > { %1337 = vmatpush3.bf16.msra.mxu1 %v1422_v8  ;;  %1352 = vmatprep.mubr.msk.bf16.mxu1 %vm1439_vm0, %v1438_v1 }
 0x166   : > { %1338 = vmatprep.subr.bf16.mxu1 %v1438_v1 }
 0x169   : > { %1339 = vmatpush3.bf16.msra.mxu1 %v1423_v12 }
 0x16a   : > { %1340 = vmatprep.subr.bf16.mxu1 %v1438_v1 }
 0x16d   : > { %1341 = vmatpush3.bf16.msra.mxu1 %v1424_v13 }
 0x16e   : > { %1342 = vmatprep.subr.bf16.mxu1 %v1438_v1 }
 0x171   : > { %1343 = vmatpush3.bf16.msra.mxu1 %v1425_v14 }
 0x172   : > { %1344 = vmatprep.subr.bf16.mxu1 %v1438_v1 }
 0x175   : > { %1345 = vmatpush3.bf16.msra.mxu1 %v1426_v15 }
 0x176   : > { %1346 = vmatprep.subr.bf16.mxu1 %v1438_v1 }
 0x179   : > { %1347 = vmatpush3.bf16.msra.mxu1 %v1427_v16 }
 0x17a   : > { %1348 = vmatprep.subr.bf16.mxu1 %v1438_v1 }
 0x17d   : > { %1349 = vmatpush3.bf16.msra.mxu1 %v1428_v17 }
 0x17e   : > { %1350 = vmatprep.subr.bf16.mxu1 %v1438_v1 }
 0x181   : > { %1351 = vmatpush3.bf16.msra.mxu1 %v1429_v19 }
 0x184   : > { %1353 = vmatmul.mubr.bf16.vlgmr.msra.gmra.mrb[0].mxu1 %v865_v21 }
 0x257   : > { %v965_v23 = vpop.f32.mrb[0].mxu1 }
 0x258   : > { %v981_v25 = vmul.f32 %v1176_v22, %v965_v23  ;;  %v1354_v26 = vpop.f32.mrb[1].mxu1 }
 0x259   : > { %v968_v27 = vpop.f32.mrb[2].mxu1 }
 0x25a   : > { %v990_v1 = vadd.f32 %v1177_v24, %v981_v25  ;;  %v982_v28 = vmul.f32 %v1176_v22, %v968_v27  ;;  %v1355_v29 = vpop.f32.mrb[3].mxu1 }
 0x25c   : > { %v992_v30 = vadd.f32 %v990_v1, %v1532_v9  ;;  %v991_v31 = vadd.f32 %v1177_v24, %v982_v28 }
 0x25e   : > { %v994_v32 = vmax.f32 %v992_v30, 0.0  ;;  %v993_v33 = vadd.f32 %v991_v31, %v1534_v10 }
 0x260   : > { %996 = vst [vmem:[%s278_s12] sm:$0xff] %v994_v32  ;;  %v995_v34 = vmax.f32 %v993_v33, 0.0 }
 0x262   : > { %997 = vst [vmem:[%s278_s12 + $0x8] sm:$0xff] %v995_v34 }
 0x263 PF: > { %s17_s24 = sadd.s32 1, %s1436_s24  }
 0x264   : > { %p14_p4 = scmp.ge.s32.totalorder %s17_s24, 4  }
 0x266   :  { %16 = sbr.rel (!%p14_p4) target bundleno = 1 (0x1), region = 82 }

</bundles_post_ra>
